<compile_context>
chip_gen: v6e
topology: v6e:2x2x1
jax: 0.10.0
libtpu: 0.0.40
codegen_flags: <defaults>
</compile_context>

<pallas_src>
import functools

import jax
import jax.numpy as jnp
from jax import lax
from jax.experimental import pallas as pl
from jax.experimental.pallas import tpu as pltpu

_SQRT1_2 = 0.7071067811865476  # 1/sqrt(2), for exact (erf) GELU


# ---------------------------------------------------------------------------
# Fused Pallas kernel: LN(embeddings) -> L encoder layers -> pooler+classifier
# ---------------------------------------------------------------------------

def _ln(x, g, b, eps):
    mean = jnp.mean(x, axis=-1, keepdims=True)
    xc = x - mean
    var = jnp.mean(xc * xc, axis=-1, keepdims=True)
    return xc * lax.rsqrt(var + eps) * g + b


def _bert_stack_kernel(emb_ref, mask_ref, eg_ref, eb_ref,
                       wqkv_ref, bqkv_ref, wo_ref, bo_ref,
                       g1_ref, b1_ref, w1_ref, bi1_ref, w2_ref, bi2_ref,
                       g2_ref, b2_ref,
                       pw_ref, pb_ref, cw_ref, cb_ref,
                       logits_ref,
                       h_sc, ctx_sc,
                       *, num_heads, head_dim, hidden, eps):
    l = pl.program_id(1)

    # --- embedding LayerNorm fused into the first layer step ---
    @pl.when(l == 0)
    def _():
        h_sc[...] = _ln(emb_ref[0], eg_ref[...], eb_ref[...], eps)

    h = h_sc[...]                       # [S, H] f32, resident across layers
    mask = mask_ref[0]                  # [1, S] additive key mask
    scale = 1.0 / (head_dim ** 0.5)

    # --- fused QKV projection: bf16 operands, f32 accumulation on the MXU ---
    qkv = jnp.dot(h.astype(jnp.bfloat16), wqkv_ref[0],
                  preferred_element_type=jnp.float32) + bqkv_ref[0]
    q = qkv[:, :hidden]
    k = qkv[:, hidden:2 * hidden]
    v = qkv[:, 2 * hidden:]

    # --- per-head attention; head contexts written into a VMEM scratch ---
    # TODO(synk): at real BERT sizes group heads into 128-lane-aligned blocks
    # (batched dot_general) and tile S so activations fit v7x's 64 MiB VMEM.
    for hd in range(num_heads):
        sl = slice(hd * head_dim, (hd + 1) * head_dim)
        qh = q[:, sl].astype(jnp.bfloat16)
        kh = k[:, sl].astype(jnp.bfloat16)
        vh = v[:, sl].astype(jnp.bfloat16)
        # q @ k^T via dot_general contraction (no explicit transpose of k)
        s = lax.dot_general(qh, kh, (((1,), (1,)), ((), ())),
                            preferred_element_type=jnp.float32) * scale + mask
        s = s - jnp.max(s, axis=-1, keepdims=True)
        p = jnp.exp(s)
        # approx reciprocal goes to the EUP slot (small relative error vs HF ref)
        p = p * pl.reciprocal(jnp.sum(p, axis=-1, keepdims=True), approx=True)
        ctx_sc[:, sl] = jnp.dot(p.astype(jnp.bfloat16), vh,
                                preferred_element_type=jnp.float32)

    # --- output projection + residual + LayerNorm 1 ---
    attn_out = jnp.dot(ctx_sc[...].astype(jnp.bfloat16), wo_ref[0],
                       preferred_element_type=jnp.float32) + bo_ref[0]
    h1 = _ln(attn_out + h, g1_ref[0], b1_ref[0], eps)

    # --- FFN: dense -> exact GELU -> dense, + residual + LayerNorm 2 ---
    inter = jnp.dot(h1.astype(jnp.bfloat16), w1_ref[0],
                    preferred_element_type=jnp.float32) + bi1_ref[0]
    inter = 0.5 * inter * (1.0 + lax.erf(inter * _SQRT1_2))
    ffn = jnp.dot(inter.astype(jnp.bfloat16), w2_ref[0],
                  preferred_element_type=jnp.float32) + bi2_ref[0]
    h2 = _ln(ffn + h1, g2_ref[0], b2_ref[0], eps)
    h_sc[...] = h2

    # --- pooler (tanh dense on CLS) + classifier, fused into the last step ---
    @pl.when(l == pl.num_programs(1) - 1)
    def _():
        cls = h2[0:1, :]                                            # [1, H]
        pooled = jnp.tanh(
            jnp.dot(cls.astype(jnp.bfloat16), pw_ref[...],
                    preferred_element_type=jnp.float32) + pb_ref[...])
        logits = jnp.dot(pooled.astype(jnp.bfloat16), cw_ref[...],
                         preferred_element_type=jnp.float32) + cb_ref[...]
        logits_ref[0] = logits.astype(logits_ref.dtype)             # [1, Cp]


def bert_classifier(emb, add_mask, params, cfg):
    """emb: [B, S, H] f32 (pre-LN embeddings); add_mask: [B, 1, S] f32."""
    B, S, H = emb.shape
    L = cfg.num_layers
    I = cfg.intermediate
    lp = params["layers"]
    Cp = params["clf_w"].shape[1]

    def _per_layer(arr):
        nd = arr.ndim
        return pl.BlockSpec((1,) + arr.shape[1:],
                            lambda b, l, nd=nd: (l,) + (0,) * (nd - 1))

    def _const(arr):
        nd = arr.ndim
        return pl.BlockSpec(arr.shape, lambda b, l, nd=nd: (0,) * nd)

    kern = functools.partial(
        _bert_stack_kernel, num_heads=cfg.num_heads, head_dim=cfg.head_dim,
        hidden=H, eps=cfg.ln_eps)

    # advisory cost estimate for XLA scheduling around the custom call
    flops_layer = 2 * S * H * 3 * H + 4 * S * S * H + 2 * S * H * H + 4 * S * H * I
    flops = B * L * flops_layer + B * (2 * H * H + 2 * H * Cp)
    transcendentals = B * L * (cfg.num_heads * S * S + S * I) + B * H
    weight_bytes = sum(int(a.size) * a.dtype.itemsize for a in lp.values())
    bytes_accessed = int(B * S * H * 4 + B * S * 4 + B * weight_bytes + B * Cp * 4)

    out = pl.pallas_call(
        kern,
        out_shape=jax.ShapeDtypeStruct((B, 1, Cp), jnp.float32),
        grid=(B, L),
        in_specs=[
            pl.BlockSpec((1, S, H), lambda b, l: (b, 0, 0)),   # embeddings
            pl.BlockSpec((1, 1, S), lambda b, l: (b, 0, 0)),   # additive mask
            _const(params["emb_ln_g"]), _const(params["emb_ln_b"]),
            _per_layer(lp["wqkv"]), _per_layer(lp["bqkv"]),
            _per_layer(lp["wo"]), _per_layer(lp["bo"]),
            _per_layer(lp["ln1_g"]), _per_layer(lp["ln1_b"]),
            _per_layer(lp["w1"]), _per_layer(lp["b1"]),
            _per_layer(lp["w2"]), _per_layer(lp["b2"]),
            _per_layer(lp["ln2_g"]), _per_layer(lp["ln2_b"]),
            _const(params["pool_w"]), _const(params["pool_b"]),
            _const(params["clf_w"]), _const(params["clf_b"]),
        ],
        out_specs=pl.BlockSpec((1, 1, Cp), lambda b, l: (b, 0, 0)),
        scratch_shapes=[
            pltpu.VMEM((S, H), jnp.float32),   # hidden state, resident across L
            pltpu.VMEM((S, H), jnp.float32),   # per-head context accumulator
        ],
        compiler_params=pltpu.CompilerParams(
            dimension_semantics=("parallel", "arbitrary"),
            vmem_limit_bytes=48 * 1024 * 1024),
        cost_estimate=pl.CostEstimate(
            flops=int(flops), transcendentals=int(transcendentals),
            bytes_accessed=bytes_accessed),
    )(emb, add_mask,
      params["emb_ln_g"], params["emb_ln_b"],
      lp["wqkv"], lp["bqkv"], lp["wo"], lp["bo"],
      lp["ln1_g"], lp["ln1_b"], lp["w1"], lp["b1"], lp["w2"], lp["b2"],
      lp["ln2_g"], lp["ln2_b"],
      params["pool_w"], params["pool_b"], params["clf_w"], params["clf_b"])
    return out[:, 0, :]                                        # [B, Cp]


# ---------------------------------------------------------------------------
# Model (embedding gather / glue in plain JAX; hot path is one fused kernel)
# ---------------------------------------------------------------------------

class Config:
    vocab_size = 100
    max_position = 64
    type_vocab_size = 2
    hidden = 32
    num_heads = 2
    head_dim = 16
    intermediate = 64
    num_layers = 2
    n_classes = 3
    ln_eps = 1e-12


def init_params(cfg, key):
    std = 0.02
    ks = iter(jax.random.split(key, 32))
    L, H, I, C = cfg.num_layers, cfg.hidden, cfg.intermediate, cfg.n_classes
    Cp = 128  # pad classifier width to a full 128-lane vreg (lane-dense store)
    bf = jnp.bfloat16

    def nrm(shape, dtype=jnp.float32):
        return (std * jax.random.normal(next(ks), shape)).astype(dtype)

    clf_w = jnp.zeros((H, Cp), jnp.float32).at[:, :C].set(nrm((H, C)))
    return {
        "tok_emb": nrm((cfg.vocab_size, H)),
        "pos_emb": nrm((cfg.max_position, H)),
        "type_emb": nrm((cfg.type_vocab_size, H)),
        "emb_ln_g": jnp.ones((1, H), jnp.float32),
        "emb_ln_b": jnp.zeros((1, H), jnp.float32),
        # per-layer params stacked along a leading L axis; matmul weights in bf16
        "layers": {
            "wqkv": nrm((L, H, 3 * H), bf),      # Q | K | V merged [H, 3H]
            "bqkv": jnp.zeros((L, 1, 3 * H), jnp.float32),
            "wo": nrm((L, H, H), bf),
            "bo": jnp.zeros((L, 1, H), jnp.float32),
            "ln1_g": jnp.ones((L, 1, H), jnp.float32),
            "ln1_b": jnp.zeros((L, 1, H), jnp.float32),
            "w1": nrm((L, H, I), bf),
            "b1": jnp.zeros((L, 1, I), jnp.float32),
            "w2": nrm((L, I, H), bf),
            "b2": jnp.zeros((L, 1, H), jnp.float32),
            "ln2_g": jnp.ones((L, 1, H), jnp.float32),
            "ln2_b": jnp.zeros((L, 1, H), jnp.float32),
        },
        "pool_w": nrm((H, H), bf),
        "pool_b": jnp.zeros((1, H), jnp.float32),
        "clf_w": clf_w.astype(bf),
        "clf_b": jnp.zeros((1, Cp), jnp.float32),
    }


def hf_clf_forward(params, cfg, input_ids, attention_mask):
    B, S = input_ids.shape
    # --- embeddings (gather + sum is glue; LN is fused into the Pallas kernel) ---
    tok = jnp.take(params["tok_emb"], input_ids, axis=0)        # [B, S, H]
    pos = params["pos_emb"][:S][None, :, :]                     # [1, S, H]
    typ = params["type_emb"][0][None, None, :]                  # token_type_ids == 0
    emb = tok + pos + typ                                       # [B, S, H]
    # additive attention mask: 0 for valid, -1e9 for pad -> [B, 1, S]
    add_mask = ((1.0 - attention_mask.astype(jnp.float32)) * -1e9)[:, None, :]

    logits_padded = bert_classifier(emb, add_mask, params, cfg)  # [B, 128]
    # HF returns SequenceClassifierOutput(logits=...); we return the logits tensor.
    return logits_padded[:, :cfg.n_classes]


if __name__ == "__main__":
    cfg = Config()
    key = jax.random.PRNGKey(0)
    pkey, dkey = jax.random.split(key)
    params = init_params(cfg, pkey)

    B, S = 2, 8
    input_ids = jax.random.randint(dkey, (B, S), 0, cfg.vocab_size, dtype=jnp.int32)
    attention_mask = jnp.array([[1, 1, 1, 1, 1, 1, 1, 1],
                                [1, 1, 1, 1, 1, 0, 0, 0]], dtype=jnp.int32)

    logits = jax.jit(lambda ids, m: hf_clf_forward(params, cfg, ids, m))(
        input_ids, attention_mask)
    jax.block_until_ready(logits)
    assert logits.shape == (B, cfg.n_classes)
    assert bool(jnp.all(jnp.isfinite(logits)))
    print("KERNEL_OK")
</pallas_src>

<mosaic_0001>
module attributes {stable_mosaic.version = 11 : i64} {
  func.func @_bert_stack_kernel(%arg0: i32, %arg1: i32, %arg2: memref<1x8x32xf32, #tpu.memory_space<vmem>>, %arg3: memref<1x1x8xf32, #tpu.memory_space<vmem>>, %arg4: memref<1x32xf32, #tpu.memory_space<vmem>>, %arg5: memref<1x32xf32, #tpu.memory_space<vmem>>, %arg6: memref<1x32x96xbf16, #tpu.memory_space<vmem>>, %arg7: memref<1x1x96xf32, #tpu.memory_space<vmem>>, %arg8: memref<1x32x32xbf16, #tpu.memory_space<vmem>>, %arg9: memref<1x1x32xf32, #tpu.memory_space<vmem>>, %arg10: memref<1x1x32xf32, #tpu.memory_space<vmem>>, %arg11: memref<1x1x32xf32, #tpu.memory_space<vmem>>, %arg12: memref<1x32x64xbf16, #tpu.memory_space<vmem>>, %arg13: memref<1x1x64xf32, #tpu.memory_space<vmem>>, %arg14: memref<1x64x32xbf16, #tpu.memory_space<vmem>>, %arg15: memref<1x1x32xf32, #tpu.memory_space<vmem>>, %arg16: memref<1x1x32xf32, #tpu.memory_space<vmem>>, %arg17: memref<1x1x32xf32, #tpu.memory_space<vmem>>, %arg18: memref<32x32xbf16, #tpu.memory_space<vmem>>, %arg19: memref<1x32xf32, #tpu.memory_space<vmem>>, %arg20: memref<32x128xbf16, #tpu.memory_space<vmem>>, %arg21: memref<1x128xf32, #tpu.memory_space<vmem>>, %arg22: memref<1x1x128xf32, #tpu.memory_space<vmem>>, %arg23: memref<8x32xf32, #tpu.memory_space<vmem>>, %arg24: memref<8x32xf32, #tpu.memory_space<vmem>>) attributes {dimension_semantics = [#tpu.dimension_semantics<parallel>, #tpu.dimension_semantics<arbitrary>], iteration_bounds = array<i64: 2, 2>, scalar_prefetch = 0 : i64, scratch_operands = 2 : i64, tpu.core_type = #tpu.core_type<tc>, window_params = [{transform_indices = @transform_0, window_bounds = array<i64: 1, 8, 32>}, {transform_indices = @transform_1, window_bounds = array<i64: 1, 1, 8>}, {pipeline_mode = #tpu.pipeline_mode<synchronous>, transform_indices = @transform_2, window_bounds = array<i64: 1, 32>}, {pipeline_mode = #tpu.pipeline_mode<synchronous>, transform_indices = @transform_3, window_bounds = array<i64: 1, 32>}, {transform_indices = @transform_4, window_bounds = array<i64: 1, 32, 96>}, {transform_indices = @transform_5, window_bounds = array<i64: 1, 1, 96>}, {transform_indices = @transform_6, window_bounds = array<i64: 1, 32, 32>}, {transform_indices = @transform_7, window_bounds = array<i64: 1, 1, 32>}, {transform_indices = @transform_8, window_bounds = array<i64: 1, 1, 32>}, {transform_indices = @transform_9, window_bounds = array<i64: 1, 1, 32>}, {transform_indices = @transform_10, window_bounds = array<i64: 1, 32, 64>}, {transform_indices = @transform_11, window_bounds = array<i64: 1, 1, 64>}, {transform_indices = @transform_12, window_bounds = array<i64: 1, 64, 32>}, {transform_indices = @transform_13, window_bounds = array<i64: 1, 1, 32>}, {transform_indices = @transform_14, window_bounds = array<i64: 1, 1, 32>}, {transform_indices = @transform_15, window_bounds = array<i64: 1, 1, 32>}, {pipeline_mode = #tpu.pipeline_mode<synchronous>, transform_indices = @transform_16, window_bounds = array<i64: 32, 32>}, {pipeline_mode = #tpu.pipeline_mode<synchronous>, transform_indices = @transform_17, window_bounds = array<i64: 1, 32>}, {pipeline_mode = #tpu.pipeline_mode<synchronous>, transform_indices = @transform_18, window_bounds = array<i64: 32, 128>}, {pipeline_mode = #tpu.pipeline_mode<synchronous>, transform_indices = @transform_19, window_bounds = array<i64: 1, 128>}, {transform_indices = @transform_20, window_bounds = array<i64: 1, 1, 128>}]} {
    %c0_i32 = arith.constant 0 : i32
    %0 = arith.cmpi eq, %arg1, %c0_i32 : i32
    %1 = arith.extui %0 : i1 to i32
    %c0_i32_0 = arith.constant 0 : i32
    %2 = arith.cmpi ne, %1, %c0_i32_0 : i32
    scf.if %2 {
      %c0_75 = arith.constant 0 : index
      %c0_76 = arith.constant 0 : index
      %c0_77 = arith.constant 0 : index
      %152 = vector.load %arg2[%c0_75, %c0_76, %c0_77] : memref<1x8x32xf32, #tpu.memory_space<vmem>>, vector<1x8x32xf32>
      %153 = vector.shape_cast %152 : vector<1x8x32xf32> to vector<8x32xf32>
      %c0_78 = arith.constant 0 : index
      %c0_79 = arith.constant 0 : index
      %154 = vector.load %arg4[%c0_78, %c0_79] : memref<1x32xf32, #tpu.memory_space<vmem>>, vector<1x32xf32>
      %c0_80 = arith.constant 0 : index
      %c0_81 = arith.constant 0 : index
      %155 = vector.load %arg5[%c0_80, %c0_81] : memref<1x32xf32, #tpu.memory_space<vmem>>, vector<1x32xf32>
      %cst_82 = arith.constant dense<0.000000e+00> : vector<8xf32>
      %156 = vector.multi_reduction <add>, %153, %cst_82 [1] : vector<8x32xf32> to vector<8xf32>
      %157 = vector.shape_cast %156 : vector<8xf32> to vector<8x1xf32>
      %cst_83 = arith.constant 3.200000e+01 : f32
      %158 = vector.broadcast %cst_83 : f32 to vector<8x1xf32>
      %159 = arith.divf %157, %158 : vector<8x1xf32>
      %160 = vector.broadcast %159 : vector<8x1xf32> to vector<8x32xf32>
      %161 = arith.subf %153, %160 : vector<8x32xf32>
      %162 = arith.mulf %161, %161 : vector<8x32xf32>
      %cst_84 = arith.constant dense<0.000000e+00> : vector<8xf32>
      %163 = vector.multi_reduction <add>, %162, %cst_84 [1] : vector<8x32xf32> to vector<8xf32>
      %164 = vector.shape_cast %163 : vector<8xf32> to vector<8x1xf32>
      %cst_85 = arith.constant 3.200000e+01 : f32
      %165 = vector.broadcast %cst_85 : f32 to vector<8x1xf32>
      %166 = arith.divf %164, %165 : vector<8x1xf32>
      %cst_86 = arith.constant 9.99999996E-13 : f32
      %167 = vector.broadcast %cst_86 : f32 to vector<8x1xf32>
      %168 = arith.addf %166, %167 : vector<8x1xf32>
      %169 = math.rsqrt %168 : vector<8x1xf32>
      %170 = vector.broadcast %169 : vector<8x1xf32> to vector<8x32xf32>
      %171 = arith.mulf %161, %170 : vector<8x32xf32>
      %172 = vector.broadcast %154 : vector<1x32xf32> to vector<8x32xf32>
      %173 = arith.mulf %171, %172 : vector<8x32xf32>
      %174 = vector.broadcast %155 : vector<1x32xf32> to vector<8x32xf32>
      %175 = arith.addf %173, %174 : vector<8x32xf32>
      %c0_87 = arith.constant 0 : index
      %c0_88 = arith.constant 0 : index
      %176 = vector.load %arg23[%c0_87, %c0_88] : memref<8x32xf32, #tpu.memory_space<vmem>>, vector<8x32xf32>
      tpu.vector_store %arg23[%c0_87, %c0_88], %175 {strides = array<i32>} : memref<8x32xf32, #tpu.memory_space<vmem>>, vector<8x32xf32>,
    } else {
    }
    %c0 = arith.constant 0 : index
    %c0_1 = arith.constant 0 : index
    %3 = vector.load %arg23[%c0, %c0_1] : memref<8x32xf32, #tpu.memory_space<vmem>>, vector<8x32xf32>
    %c0_2 = arith.constant 0 : index
    %c0_3 = arith.constant 0 : index
    %c0_4 = arith.constant 0 : index
    %4 = vector.load %arg3[%c0_2, %c0_3, %c0_4] : memref<1x1x8xf32, #tpu.memory_space<vmem>>, vector<1x1x8xf32>
    %5 = vector.shape_cast %4 : vector<1x1x8xf32> to vector<1x8xf32>
    %6 = arith.truncf %3 : vector<8x32xf32> to vector<8x32xbf16>
    %c0_5 = arith.constant 0 : index
    %c0_6 = arith.constant 0 : index
    %c0_7 = arith.constant 0 : index
    %7 = vector.load %arg6[%c0_5, %c0_6, %c0_7] : memref<1x32x96xbf16, #tpu.memory_space<vmem>>, vector<1x32x96xbf16>
    %8 = vector.shape_cast %7 : vector<1x32x96xbf16> to vector<32x96xbf16>
    %cst = arith.constant dense<0.000000e+00> : vector<8x96xf32>
    %9 = tpu.matmul %6, %8, %cst {dimension_numbers = #tpu.dot_dimension_numbers<[1], [0], [0], [1], [0, 0, 1, 1], [], []>} : vector<8x32xbf16>, vector<32x96xbf16>, vector<8x96xf32> -> vector<8x96xf32>
    %c0_8 = arith.constant 0 : index
    %c0_9 = arith.constant 0 : index
    %c0_10 = arith.constant 0 : index
    %10 = vector.load %arg7[%c0_8, %c0_9, %c0_10] : memref<1x1x96xf32, #tpu.memory_space<vmem>>, vector<1x1x96xf32>
    %11 = vector.shape_cast %10 : vector<1x1x96xf32> to vector<1x96xf32>
    %12 = vector.broadcast %11 : vector<1x96xf32> to vector<8x96xf32>
    %13 = arith.addf %9, %12 : vector<8x96xf32>
    %14 = vector.extract_strided_slice %13 {offsets = [0, 0], sizes = [8, 32], strides = [1, 1]} : vector<8x96xf32> to vector<8x32xf32>
    %15 = vector.extract_strided_slice %13 {offsets = [0, 32], sizes = [8, 32], strides = [1, 1]} : vector<8x96xf32> to vector<8x32xf32>
    %16 = vector.extract_strided_slice %13 {offsets = [0, 64], sizes = [8, 32], strides = [1, 1]} : vector<8x96xf32> to vector<8x32xf32>
    %17 = vector.extract_strided_slice %14 {offsets = [0, 0], sizes = [8, 16], strides = [1, 1]} : vector<8x32xf32> to vector<8x16xf32>
    %18 = arith.truncf %17 : vector<8x16xf32> to vector<8x16xbf16>
    %19 = vector.extract_strided_slice %15 {offsets = [0, 0], sizes = [8, 16], strides = [1, 1]} : vector<8x32xf32> to vector<8x16xf32>
    %20 = arith.truncf %19 : vector<8x16xf32> to vector<8x16xbf16>
    %21 = vector.extract_strided_slice %16 {offsets = [0, 0], sizes = [8, 16], strides = [1, 1]} : vector<8x32xf32> to vector<8x16xf32>
    %22 = arith.truncf %21 : vector<8x16xf32> to vector<8x16xbf16>
    %cst_11 = arith.constant dense<0.000000e+00> : vector<8x8xf32>
    %23 = tpu.matmul %18, %20, %cst_11 {dimension_numbers = #tpu.dot_dimension_numbers<[1], [1], [0], [0], [0, 0, 1, 0], [], []>} : vector<8x16xbf16>, vector<8x16xbf16>, vector<8x8xf32> -> vector<8x8xf32>
    %cst_12 = arith.constant 2.500000e-01 : f32
    %24 = vector.broadcast %cst_12 : f32 to vector<8x8xf32>
    %25 = arith.mulf %23, %24 : vector<8x8xf32>
    %26 = vector.broadcast %5 : vector<1x8xf32> to vector<8x8xf32>
    %27 = arith.addf %25, %26 : vector<8x8xf32>
    %cst_13 = arith.constant dense<0xFF800000> : vector<8xf32>
    %28 = vector.multi_reduction <maximumf>, %27, %cst_13 [1] : vector<8x8xf32> to vector<8xf32>
    %29 = vector.shape_cast %28 : vector<8xf32> to vector<8x1xf32>
    %30 = vector.broadcast %29 : vector<8x1xf32> to vector<8x8xf32>
    %31 = arith.subf %27, %30 : vector<8x8xf32>
    %32 = math.exp %31 : vector<8x8xf32>
    %cst_14 = arith.constant dense<0.000000e+00> : vector<8xf32>
    %33 = vector.multi_reduction <add>, %32, %cst_14 [1] : vector<8x8xf32> to vector<8xf32>
    %34 = vector.shape_cast %33 : vector<8xf32> to vector<8x1xf32>
    %35 = tpu.reciprocal %34 {approx = true} : vector<8x1xf32> -> vector<8x1xf32>
    %36 = vector.broadcast %35 : vector<8x1xf32> to vector<8x8xf32>
    %37 = arith.mulf %32, %36 : vector<8x8xf32>
    %38 = arith.truncf %37 : vector<8x8xf32> to vector<8x8xbf16>
    %cst_15 = arith.constant dense<0.000000e+00> : vector<8x16xf32>
    %39 = tpu.matmul %38, %22, %cst_15 {dimension_numbers = #tpu.dot_dimension_numbers<[1], [0], [0], [1], [0, 0, 1, 1], [], []>} : vector<8x8xbf16>, vector<8x16xbf16>, vector<8x16xf32> -> vector<8x16xf32>
    %c0_16 = arith.constant 0 : index
    %c0_17 = arith.constant 0 : index
    %40 = vector.load %arg24[%c0_16, %c0_17] : memref<8x32xf32, #tpu.memory_space<vmem>>, vector<8x16xf32>
    tpu.vector_store %arg24[%c0_16, %c0_17], %39 {strides = array<i32>} : memref<8x32xf32, #tpu.memory_space<vmem>>, vector<8x16xf32>,
    %41 = vector.extract_strided_slice %14 {offsets = [0, 16], sizes = [8, 16], strides = [1, 1]} : vector<8x32xf32> to vector<8x16xf32>
    %42 = arith.truncf %41 : vector<8x16xf32> to vector<8x16xbf16>
    %43 = vector.extract_strided_slice %15 {offsets = [0, 16], sizes = [8, 16], strides = [1, 1]} : vector<8x32xf32> to vector<8x16xf32>
    %44 = arith.truncf %43 : vector<8x16xf32> to vector<8x16xbf16>
    %45 = vector.extract_strided_slice %16 {offsets = [0, 16], sizes = [8, 16], strides = [1, 1]} : vector<8x32xf32> to vector<8x16xf32>
    %46 = arith.truncf %45 : vector<8x16xf32> to vector<8x16xbf16>
    %cst_18 = arith.constant dense<0.000000e+00> : vector<8x8xf32>
    %47 = tpu.matmul %42, %44, %cst_18 {dimension_numbers = #tpu.dot_dimension_numbers<[1], [1], [0], [0], [0, 0, 1, 0], [], []>} : vector<8x16xbf16>, vector<8x16xbf16>, vector<8x8xf32> -> vector<8x8xf32>
    %cst_19 = arith.constant 2.500000e-01 : f32
    %48 = vector.broadcast %cst_19 : f32 to vector<8x8xf32>
    %49 = arith.mulf %47, %48 : vector<8x8xf32>
    %50 = vector.broadcast %5 : vector<1x8xf32> to vector<8x8xf32>
    %51 = arith.addf %49, %50 : vector<8x8xf32>
    %cst_20 = arith.constant dense<0xFF800000> : vector<8xf32>
    %52 = vector.multi_reduction <maximumf>, %51, %cst_20 [1] : vector<8x8xf32> to vector<8xf32>
    %53 = vector.shape_cast %52 : vector<8xf32> to vector<8x1xf32>
    %54 = vector.broadcast %53 : vector<8x1xf32> to vector<8x8xf32>
    %55 = arith.subf %51, %54 : vector<8x8xf32>
    %56 = math.exp %55 : vector<8x8xf32>
    %cst_21 = arith.constant dense<0.000000e+00> : vector<8xf32>
    %57 = vector.multi_reduction <add>, %56, %cst_21 [1] : vector<8x8xf32> to vector<8xf32>
    %58 = vector.shape_cast %57 : vector<8xf32> to vector<8x1xf32>
    %59 = tpu.reciprocal %58 {approx = true} : vector<8x1xf32> -> vector<8x1xf32>
    %60 = vector.broadcast %59 : vector<8x1xf32> to vector<8x8xf32>
    %61 = arith.mulf %56, %60 : vector<8x8xf32>
    %62 = arith.truncf %61 : vector<8x8xf32> to vector<8x8xbf16>
    %cst_22 = arith.constant dense<0.000000e+00> : vector<8x16xf32>
    %63 = tpu.matmul %62, %46, %cst_22 {dimension_numbers = #tpu.dot_dimension_numbers<[1], [0], [0], [1], [0, 0, 1, 1], [], []>} : vector<8x8xbf16>, vector<8x16xbf16>, vector<8x16xf32> -> vector<8x16xf32>
    %c0_23 = arith.constant 0 : index
    %c16 = arith.constant 16 : index
    %64 = vector.load %arg24[%c0_23, %c16] : memref<8x32xf32, #tpu.memory_space<vmem>>, vector<8x16xf32>
    tpu.vector_store %arg24[%c0_23, %c16], %63 {strides = array<i32>} : memref<8x32xf32, #tpu.memory_space<vmem>>, vector<8x16xf32>,
    %c0_24 = arith.constant 0 : index
    %c0_25 = arith.constant 0 : index
    %65 = vector.load %arg24[%c0_24, %c0_25] : memref<8x32xf32, #tpu.memory_space<vmem>>, vector<8x32xf32>
    %66 = arith.truncf %65 : vector<8x32xf32> to vector<8x32xbf16>
    %c0_26 = arith.constant 0 : index
    %c0_27 = arith.constant 0 : index
    %c0_28 = arith.constant 0 : index
    %67 = vector.load %arg8[%c0_26, %c0_27, %c0_28] : memref<1x32x32xbf16, #tpu.memory_space<vmem>>, vector<1x32x32xbf16>
    %68 = vector.shape_cast %67 : vector<1x32x32xbf16> to vector<32x32xbf16>
    %cst_29 = arith.constant dense<0.000000e+00> : vector<8x32xf32>
    %69 = tpu.matmul %66, %68, %cst_29 {dimension_numbers = #tpu.dot_dimension_numbers<[1], [0], [0], [1], [0, 0, 1, 1], [], []>} : vector<8x32xbf16>, vector<32x32xbf16>, vector<8x32xf32> -> vector<8x32xf32>
    %c0_30 = arith.constant 0 : index
    %c0_31 = arith.constant 0 : index
    %c0_32 = arith.constant 0 : index
    %70 = vector.load %arg9[%c0_30, %c0_31, %c0_32] : memref<1x1x32xf32, #tpu.memory_space<vmem>>, vector<1x1x32xf32>
    %71 = vector.shape_cast %70 : vector<1x1x32xf32> to vector<1x32xf32>
    %72 = vector.broadcast %71 : vector<1x32xf32> to vector<8x32xf32>
    %73 = arith.addf %69, %72 : vector<8x32xf32>
    %74 = arith.addf %73, %3 : vector<8x32xf32>
    %c0_33 = arith.constant 0 : index
    %c0_34 = arith.constant 0 : index
    %c0_35 = arith.constant 0 : index
    %75 = vector.load %arg10[%c0_33, %c0_34, %c0_35] : memref<1x1x32xf32, #tpu.memory_space<vmem>>, vector<1x1x32xf32>
    %76 = vector.shape_cast %75 : vector<1x1x32xf32> to vector<1x32xf32>
    %c0_36 = arith.constant 0 : index
    %c0_37 = arith.constant 0 : index
    %c0_38 = arith.constant 0 : index
    %77 = vector.load %arg11[%c0_36, %c0_37, %c0_38] : memref<1x1x32xf32, #tpu.memory_space<vmem>>, vector<1x1x32xf32>
    %78 = vector.shape_cast %77 : vector<1x1x32xf32> to vector<1x32xf32>
    %cst_39 = arith.constant dense<0.000000e+00> : vector<8xf32>
    %79 = vector.multi_reduction <add>, %74, %cst_39 [1] : vector<8x32xf32> to vector<8xf32>
    %80 = vector.shape_cast %79 : vector<8xf32> to vector<8x1xf32>
    %cst_40 = arith.constant 3.200000e+01 : f32
    %81 = vector.broadcast %cst_40 : f32 to vector<8x1xf32>
    %82 = arith.divf %80, %81 : vector<8x1xf32>
    %83 = vector.broadcast %82 : vector<8x1xf32> to vector<8x32xf32>
    %84 = arith.subf %74, %83 : vector<8x32xf32>
    %85 = arith.mulf %84, %84 : vector<8x32xf32>
    %cst_41 = arith.constant dense<0.000000e+00> : vector<8xf32>
    %86 = vector.multi_reduction <add>, %85, %cst_41 [1] : vector<8x32xf32> to vector<8xf32>
    %87 = vector.shape_cast %86 : vector<8xf32> to vector<8x1xf32>
    %cst_42 = arith.constant 3.200000e+01 : f32
    %88 = vector.broadcast %cst_42 : f32 to vector<8x1xf32>
    %89 = arith.divf %87, %88 : vector<8x1xf32>
    %cst_43 = arith.constant 9.99999996E-13 : f32
    %90 = vector.broadcast %cst_43 : f32 to vector<8x1xf32>
    %91 = arith.addf %89, %90 : vector<8x1xf32>
    %92 = math.rsqrt %91 : vector<8x1xf32>
    %93 = vector.broadcast %92 : vector<8x1xf32> to vector<8x32xf32>
    %94 = arith.mulf %84, %93 : vector<8x32xf32>
    %95 = vector.broadcast %76 : vector<1x32xf32> to vector<8x32xf32>
    %96 = arith.mulf %94, %95 : vector<8x32xf32>
    %97 = vector.broadcast %78 : vector<1x32xf32> to vector<8x32xf32>
    %98 = arith.addf %96, %97 : vector<8x32xf32>
    %99 = arith.truncf %98 : vector<8x32xf32> to vector<8x32xbf16>
    %c0_44 = arith.constant 0 : index
    %c0_45 = arith.constant 0 : index
    %c0_46 = arith.constant 0 : index
    %100 = vector.load %arg12[%c0_44, %c0_45, %c0_46] : memref<1x32x64xbf16, #tpu.memory_space<vmem>>, vector<1x32x64xbf16>
    %101 = vector.shape_cast %100 : vector<1x32x64xbf16> to vector<32x64xbf16>
    %cst_47 = arith.constant dense<0.000000e+00> : vector<8x64xf32>
    %102 = tpu.matmul %99, %101, %cst_47 {dimension_numbers = #tpu.dot_dimension_numbers<[1], [0], [0], [1], [0, 0, 1, 1], [], []>} : vector<8x32xbf16>, vector<32x64xbf16>, vector<8x64xf32> -> vector<8x64xf32>
    %c0_48 = arith.constant 0 : index
    %c0_49 = arith.constant 0 : index
    %c0_50 = arith.constant 0 : index
    %103 = vector.load %arg13[%c0_48, %c0_49, %c0_50] : memref<1x1x64xf32, #tpu.memory_space<vmem>>, vector<1x1x64xf32>
    %104 = vector.shape_cast %103 : vector<1x1x64xf32> to vector<1x64xf32>
    %105 = vector.broadcast %104 : vector<1x64xf32> to vector<8x64xf32>
    %106 = arith.addf %102, %105 : vector<8x64xf32>
    %cst_51 = arith.constant 5.000000e-01 : f32
    %107 = vector.broadcast %cst_51 : f32 to vector<8x64xf32>
    %108 = arith.mulf %107, %106 : vector<8x64xf32>
    %cst_52 = arith.constant 0.707106769 : f32
    %109 = vector.broadcast %cst_52 : f32 to vector<8x64xf32>
    %110 = arith.mulf %106, %109 : vector<8x64xf32>
    %111 = math.erf %110 : vector<8x64xf32>
    %cst_53 = arith.constant 1.000000e+00 : f32
    %112 = vector.broadcast %cst_53 : f32 to vector<8x64xf32>
    %113 = arith.addf %112, %111 : vector<8x64xf32>
    %114 = arith.mulf %108, %113 : vector<8x64xf32>
    %115 = arith.truncf %114 : vector<8x64xf32> to vector<8x64xbf16>
    %c0_54 = arith.constant 0 : index
    %c0_55 = arith.constant 0 : index
    %c0_56 = arith.constant 0 : index
    %116 = vector.load %arg14[%c0_54, %c0_55, %c0_56] : memref<1x64x32xbf16, #tpu.memory_space<vmem>>, vector<1x64x32xbf16>
    %117 = vector.shape_cast %116 : vector<1x64x32xbf16> to vector<64x32xbf16>
    %cst_57 = arith.constant dense<0.000000e+00> : vector<8x32xf32>
    %118 = tpu.matmul %115, %117, %cst_57 {dimension_numbers = #tpu.dot_dimension_numbers<[1], [0], [0], [1], [0, 0, 1, 1], [], []>} : vector<8x64xbf16>, vector<64x32xbf16>, vector<8x32xf32> -> vector<8x32xf32>
    %c0_58 = arith.constant 0 : index
    %c0_59 = arith.constant 0 : index
    %c0_60 = arith.constant 0 : index
    %119 = vector.load %arg15[%c0_58, %c0_59, %c0_60] : memref<1x1x32xf32, #tpu.memory_space<vmem>>, vector<1x1x32xf32>
    %120 = vector.shape_cast %119 : vector<1x1x32xf32> to vector<1x32xf32>
    %121 = vector.broadcast %120 : vector<1x32xf32> to vector<8x32xf32>
    %122 = arith.addf %118, %121 : vector<8x32xf32>
    %123 = arith.addf %122, %98 : vector<8x32xf32>
    %c0_61 = arith.constant 0 : index
    %c0_62 = arith.constant 0 : index
    %c0_63 = arith.constant 0 : index
    %124 = vector.load %arg16[%c0_61, %c0_62, %c0_63] : memref<1x1x32xf32, #tpu.memory_space<vmem>>, vector<1x1x32xf32>
    %125 = vector.shape_cast %124 : vector<1x1x32xf32> to vector<1x32xf32>
    %c0_64 = arith.constant 0 : index
    %c0_65 = arith.constant 0 : index
    %c0_66 = arith.constant 0 : index
    %126 = vector.load %arg17[%c0_64, %c0_65, %c0_66] : memref<1x1x32xf32, #tpu.memory_space<vmem>>, vector<1x1x32xf32>
    %127 = vector.shape_cast %126 : vector<1x1x32xf32> to vector<1x32xf32>
    %cst_67 = arith.constant dense<0.000000e+00> : vector<8xf32>
    %128 = vector.multi_reduction <add>, %123, %cst_67 [1] : vector<8x32xf32> to vector<8xf32>
    %129 = vector.shape_cast %128 : vector<8xf32> to vector<8x1xf32>
    %cst_68 = arith.constant 3.200000e+01 : f32
    %130 = vector.broadcast %cst_68 : f32 to vector<8x1xf32>
    %131 = arith.divf %129, %130 : vector<8x1xf32>
    %132 = vector.broadcast %131 : vector<8x1xf32> to vector<8x32xf32>
    %133 = arith.subf %123, %132 : vector<8x32xf32>
    %134 = arith.mulf %133, %133 : vector<8x32xf32>
    %cst_69 = arith.constant dense<0.000000e+00> : vector<8xf32>
    %135 = vector.multi_reduction <add>, %134, %cst_69 [1] : vector<8x32xf32> to vector<8xf32>
    %136 = vector.shape_cast %135 : vector<8xf32> to vector<8x1xf32>
    %cst_70 = arith.constant 3.200000e+01 : f32
    %137 = vector.broadcast %cst_70 : f32 to vector<8x1xf32>
    %138 = arith.divf %136, %137 : vector<8x1xf32>
    %cst_71 = arith.constant 9.99999996E-13 : f32
    %139 = vector.broadcast %cst_71 : f32 to vector<8x1xf32>
    %140 = arith.addf %138, %139 : vector<8x1xf32>
    %141 = math.rsqrt %140 : vector<8x1xf32>
    %142 = vector.broadcast %141 : vector<8x1xf32> to vector<8x32xf32>
    %143 = arith.mulf %133, %142 : vector<8x32xf32>
    %144 = vector.broadcast %125 : vector<1x32xf32> to vector<8x32xf32>
    %145 = arith.mulf %143, %144 : vector<8x32xf32>
    %146 = vector.broadcast %127 : vector<1x32xf32> to vector<8x32xf32>
    %147 = arith.addf %145, %146 : vector<8x32xf32>
    %c0_72 = arith.constant 0 : index
    %c0_73 = arith.constant 0 : index
    %148 = vector.load %arg23[%c0_72, %c0_73] : memref<8x32xf32, #tpu.memory_space<vmem>>, vector<8x32xf32>
    tpu.vector_store %arg23[%c0_72, %c0_73], %147 {strides = array<i32>} : memref<8x32xf32, #tpu.memory_space<vmem>>, vector<8x32xf32>,
    %c1_i32 = arith.constant 1 : i32
    %149 = arith.cmpi eq, %arg1, %c1_i32 : i32
    %150 = arith.extui %149 : i1 to i32
    %c0_i32_74 = arith.constant 0 : i32
    %151 = arith.cmpi ne, %150, %c0_i32_74 : i32
    scf.if %151 {
      %152 = vector.extract_strided_slice %147 {offsets = [0, 0], sizes = [1, 32], strides = [1, 1]} : vector<8x32xf32> to vector<1x32xf32>
      %153 = arith.truncf %152 : vector<1x32xf32> to vector<1x32xbf16>
      %c0_75 = arith.constant 0 : index
      %c0_76 = arith.constant 0 : index
      %154 = vector.load %arg18[%c0_75, %c0_76] : memref<32x32xbf16, #tpu.memory_space<vmem>>, vector<32x32xbf16>
      %cst_77 = arith.constant dense<0.000000e+00> : vector<1x32xf32>
      %155 = tpu.matmul %153, %154, %cst_77 {dimension_numbers = #tpu.dot_dimension_numbers<[1], [0], [0], [1], [0, 0, 1, 1], [], []>} : vector<1x32xbf16>, vector<32x32xbf16>, vector<1x32xf32> -> vector<1x32xf32>
      %c0_78 = arith.constant 0 : index
      %c0_79 = arith.constant 0 : index
      %156 = vector.load %arg19[%c0_78, %c0_79] : memref<1x32xf32, #tpu.memory_space<vmem>>, vector<1x32xf32>
      %157 = arith.addf %155, %156 : vector<1x32xf32>
      %158 = math.tanh %157 : vector<1x32xf32>
      %159 = arith.truncf %158 : vector<1x32xf32> to vector<1x32xbf16>
      %c0_80 = arith.constant 0 : index
      %c0_81 = arith.constant 0 : index
      %160 = vector.load %arg20[%c0_80, %c0_81] : memref<32x128xbf16, #tpu.memory_space<vmem>>, vector<32x128xbf16>
      %cst_82 = arith.constant dense<0.000000e+00> : vector<1x128xf32>
      %161 = tpu.matmul %159, %160, %cst_82 {dimension_numbers = #tpu.dot_dimension_numbers<[1], [0], [0], [1], [0, 0, 1, 1], [], []>} : vector<1x32xbf16>, vector<32x128xbf16>, vector<1x128xf32> -> vector<1x128xf32>
      %c0_83 = arith.constant 0 : index
      %c0_84 = arith.constant 0 : index
      %162 = vector.load %arg21[%c0_83, %c0_84] : memref<1x128xf32, #tpu.memory_space<vmem>>, vector<1x128xf32>
      %163 = arith.addf %161, %162 : vector<1x128xf32>
      %c0_85 = arith.constant 0 : index
      %c0_86 = arith.constant 0 : index
      %c0_87 = arith.constant 0 : index
      %164 = vector.load %arg22[%c0_85, %c0_86, %c0_87] : memref<1x1x128xf32, #tpu.memory_space<vmem>>, vector<1x1x128xf32>
      %165 = vector.shape_cast %164 : vector<1x1x128xf32> to vector<1x128xf32>
      %166 = vector.shape_cast %163 : vector<1x128xf32> to vector<1x1x128xf32>
      tpu.vector_store %arg22[%c0_85, %c0_86, %c0_87], %166 {strides = array<i32>} : memref<1x1x128xf32, #tpu.memory_space<vmem>>, vector<1x1x128xf32>,
    } else {
    }
    return
  }
  func.func @transform_0(%arg0: i32, %arg1: i32) -> (i32, i32, i32) {
    %c0_i32 = arith.constant 0 : i32
    %c0_i32_0 = arith.constant 0 : i32
    %c0_i32_1 = arith.constant 0 : i32
    return %arg0, %c0_i32, %c0_i32_0 : i32, i32, i32
  }
  func.func @transform_1(%arg0: i32, %arg1: i32) -> (i32, i32, i32) {
    %c0_i32 = arith.constant 0 : i32
    %c0_i32_0 = arith.constant 0 : i32
    %c0_i32_1 = arith.constant 0 : i32
    return %arg0, %c0_i32, %c0_i32_0 : i32, i32, i32
  }
  func.func @transform_2(%arg0: i32, %arg1: i32) -> (i32, i32) {
    %c0_i32 = arith.constant 0 : i32
    %c0_i32_0 = arith.constant 0 : i32
    %c0_i32_1 = arith.constant 0 : i32
    return %c0_i32, %c0_i32_0 : i32, i32
  }
  func.func @transform_3(%arg0: i32, %arg1: i32) -> (i32, i32) {
    %c0_i32 = arith.constant 0 : i32
    %c0_i32_0 = arith.constant 0 : i32
    %c0_i32_1 = arith.constant 0 : i32
    return %c0_i32, %c0_i32_0 : i32, i32
  }
  func.func @transform_4(%arg0: i32, %arg1: i32) -> (i32, i32, i32) {
    %c0_i32 = arith.constant 0 : i32
    %c0_i32_0 = arith.constant 0 : i32
    %c0_i32_1 = arith.constant 0 : i32
    return %arg1, %c0_i32, %c0_i32_0 : i32, i32, i32
  }
  func.func @transform_5(%arg0: i32, %arg1: i32) -> (i32, i32, i32) {
    %c0_i32 = arith.constant 0 : i32
    %c0_i32_0 = arith.constant 0 : i32
    %c0_i32_1 = arith.constant 0 : i32
    return %arg1, %c0_i32, %c0_i32_0 : i32, i32, i32
  }
  func.func @transform_6(%arg0: i32, %arg1: i32) -> (i32, i32, i32) {
    %c0_i32 = arith.constant 0 : i32
    %c0_i32_0 = arith.constant 0 : i32
    %c0_i32_1 = arith.constant 0 : i32
    return %arg1, %c0_i32, %c0_i32_0 : i32, i32, i32
  }
  func.func @transform_7(%arg0: i32, %arg1: i32) -> (i32, i32, i32) {
    %c0_i32 = arith.constant 0 : i32
    %c0_i32_0 = arith.constant 0 : i32
    %c0_i32_1 = arith.constant 0 : i32
    return %arg1, %c0_i32, %c0_i32_0 : i32, i32, i32
  }
  func.func @transform_8(%arg0: i32, %arg1: i32) -> (i32, i32, i32) {
    %c0_i32 = arith.constant 0 : i32
    %c0_i32_0 = arith.constant 0 : i32
    %c0_i32_1 = arith.constant 0 : i32
    return %arg1, %c0_i32, %c0_i32_0 : i32, i32, i32
  }
  func.func @transform_9(%arg0: i32, %arg1: i32) -> (i32, i32, i32) {
    %c0_i32 = arith.constant 0 : i32
    %c0_i32_0 = arith.constant 0 : i32
    %c0_i32_1 = arith.constant 0 : i32
    return %arg1, %c0_i32, %c0_i32_0 : i32, i32, i32
  }
  func.func @transform_10(%arg0: i32, %arg1: i32) -> (i32, i32, i32) {
    %c0_i32 = arith.constant 0 : i32
    %c0_i32_0 = arith.constant 0 : i32
    %c0_i32_1 = arith.constant 0 : i32
    return %arg1, %c0_i32, %c0_i32_0 : i32, i32, i32
  }
  func.func @transform_11(%arg0: i32, %arg1: i32) -> (i32, i32, i32) {
    %c0_i32 = arith.constant 0 : i32
    %c0_i32_0 = arith.constant 0 : i32
    %c0_i32_1 = arith.constant 0 : i32
    return %arg1, %c0_i32, %c0_i32_0 : i32, i32, i32
  }
  func.func @transform_12(%arg0: i32, %arg1: i32) -> (i32, i32, i32) {
    %c0_i32 = arith.constant 0 : i32
    %c0_i32_0 = arith.constant 0 : i32
    %c0_i32_1 = arith.constant 0 : i32
    return %arg1, %c0_i32, %c0_i32_0 : i32, i32, i32
  }
  func.func @transform_13(%arg0: i32, %arg1: i32) -> (i32, i32, i32) {
    %c0_i32 = arith.constant 0 : i32
    %c0_i32_0 = arith.constant 0 : i32
    %c0_i32_1 = arith.constant 0 : i32
    return %arg1, %c0_i32, %c0_i32_0 : i32, i32, i32
  }
  func.func @transform_14(%arg0: i32, %arg1: i32) -> (i32, i32, i32) {
    %c0_i32 = arith.constant 0 : i32
    %c0_i32_0 = arith.constant 0 : i32
    %c0_i32_1 = arith.constant 0 : i32
    return %arg1, %c0_i32, %c0_i32_0 : i32, i32, i32
  }
  func.func @transform_15(%arg0: i32, %arg1: i32) -> (i32, i32, i32) {
    %c0_i32 = arith.constant 0 : i32
    %c0_i32_0 = arith.constant 0 : i32
    %c0_i32_1 = arith.constant 0 : i32
    return %arg1, %c0_i32, %c0_i32_0 : i32, i32, i32
  }
  func.func @transform_16(%arg0: i32, %arg1: i32) -> (i32, i32) {
    %c0_i32 = arith.constant 0 : i32
    %c0_i32_0 = arith.constant 0 : i32
    %c0_i32_1 = arith.constant 0 : i32
    return %c0_i32, %c0_i32_0 : i32, i32
  }
  func.func @transform_17(%arg0: i32, %arg1: i32) -> (i32, i32) {
    %c0_i32 = arith.constant 0 : i32
    %c0_i32_0 = arith.constant 0 : i32
    %c0_i32_1 = arith.constant 0 : i32
    return %c0_i32, %c0_i32_0 : i32, i32
  }
  func.func @transform_18(%arg0: i32, %arg1: i32) -> (i32, i32) {
    %c0_i32 = arith.constant 0 : i32
    %c0_i32_0 = arith.constant 0 : i32
    %c0_i32_1 = arith.constant 0 : i32
    return %c0_i32, %c0_i32_0 : i32, i32
  }
  func.func @transform_19(%arg0: i32, %arg1: i32) -> (i32, i32) {
    %c0_i32 = arith.constant 0 : i32
    %c0_i32_0 = arith.constant 0 : i32
    %c0_i32_1 = arith.constant 0 : i32
    return %c0_i32, %c0_i32_0 : i32, i32
  }
  func.func @transform_20(%arg0: i32, %arg1: i32) -> (i32, i32, i32) {
    %c0_i32 = arith.constant 0 : i32
    %c0_i32_0 = arith.constant 0 : i32
    %c0_i32_1 = arith.constant 0 : i32
    return %arg0, %c0_i32, %c0_i32_0 : i32, i32, i32
  }
}

</mosaic_0001>

<bundles_post_ra>
// kernel: _lambda_.1
= control target key start
LH: loop header
LB: loop body
LE: loop exit
PB: predicated region body
PF: predicated region fallthrough
CT: control target
= control target key end

     0   :  { %s2629_s0 = inlined_call_operand.vmem [shape: f32[2,8,32], index: 0, kind: input, shape index: {}]   ;;  %s2630_s1 = inlined_call_operand.vmem [shape: f32[2,1,8], index: 1, kind: input, shape index: {}]   ;;  %s2631_s2 = inlined_call_operand.vmem [shape: f32[1,32], index: 2, kind: input, shape index: {}]   ;;  %s2632_s3 = inlined_call_operand.vmem [shape: f32[1,32], index: 3, kind: input, shape index: {}, may-alias: {3,17}]   ;;  %s2633_s4 = inlined_call_operand.vmem [shape: bf16[2,32,96], index: 4, kind: input, shape index: {}]   ;;  %s2634_s5 = inlined_call_operand.vmem [shape: f32[2,1,96], index: 5, kind: input, shape index: {}]   ;;  %s2635_s6 = inlined_call_operand.vmem [shape: bf16[2,32,32], index: 6, kind: input, shape index: {}]   ;;  %s2636_s7 = inlined_call_operand.vmem [shape: f32[2,1,32], index: 7, kind: input, shape index: {}, may-alias: {7,9,13,15}]   ;;  %s2637_s8 = inlined_call_operand.vmem [shape: f32[2,1,32], index: 8, kind: input, shape index: {}, may-alias: {8,14}]   ;;  %s2638_s9 = inlined_call_operand.vmem [shape: f32[2,1,32], index: 9, kind: input, shape index: {}, may-alias: {7,9,13,15}]   ;;  %s2639_s10 = inlined_call_operand.vmem [shape: bf16[2,32,64], index: 10, kind: input, shape index: {}]   ;;  %s2640_s11 = inlined_call_operand.vmem [shape: f32[2,1,64], index: 11, kind: input, shape index: {}]   ;;  %s2641_s12 = inlined_call_operand.vmem [shape: bf16[2,64,32], index: 12, kind: input, shape index: {}]   ;;  %s2642_s13 = inlined_call_operand.vmem [shape: f32[2,1,32], index: 13, kind: input, shape index: {}, may-alias: {7,9,13,15}]   ;;  %s2643_s14 = inlined_call_operand.vmem [shape: f32[2,1,32], index: 14, kind: input, shape index: {}, may-alias: {8,14}]   ;;  %s2644_s15 = inlined_call_operand.vmem [shape: f32[2,1,32], index: 15, kind: input, shape index: {}, may-alias: {7,9,13,15}]   ;;  %s2645_s16 = inlined_call_operand.vmem [shape: bf16[32,32], index: 16, kind: input, shape index: {}]   ;;  %s2646_s17 = inlined_call_operand.vmem [shape: f32[1,32], index: 17, kind: input, shape index: {}, may-alias: {3,17}]   ;;  %s2647_s18 = inlined_call_operand.vmem [shape: bf16[32,128], index: 18, kind: input, shape index: {}]   ;;  %s2648_s19 = inlined_call_operand.vmem [shape: f32[1,128], index: 19, kind: input, shape index: {}]   ;;  %s2649_s20 = inlined_call_operand.hbm [shape: f32[2,1,128], index: 20, kind: output, shape index: {}]  }
   0x1   :  { %2665 = sst [smem:[#allocation19_spill]] %s2629_s0 }
   0x2   :  { %2666 = sst [smem:[#allocation20_spill]] %s2630_s1 }
   0x3   :  { %2667 = sst [smem:[#allocation21_spill]] %s2631_s2 }
   0x4   :  { %2668 = sst [smem:[#allocation22_spill]] %s2632_s3 }
   0x5   :  { %2669 = sst [smem:[#allocation23_spill]] %s2633_s4 }
   0x6   :  { %2670 = sst [smem:[#allocation24_spill]] %s2635_s6 }
   0x7   :  { %2671 = sst [smem:[#allocation25_spill]] %s2638_s9 }
   0x8   :  { %2672 = sst [smem:[#allocation26_spill]] %s2639_s10 }
   0x9   :  { %2673 = sst [smem:[#allocation27_spill]] %s2643_s14 }
   0xa   :  { %2674 = sst [smem:[#allocation28_spill]] %s2644_s15 }
   0xb   :  { %2675 = sst [smem:[#allocation29_spill]] %s2645_s16 }
   0xc   :  { %2676 = sst [smem:[#allocation30_spill]] %s2646_s17 }
   0xd   :  { %2677 = sst [smem:[#allocation31_spill]] %s2647_s18 }
   0xe   :  { %2678 = sst [smem:[#allocation32_spill]] %s2648_s19 }
   0xf   :  { %2679 = sst [smem:[#allocation33_spill]] %s2649_s20 }
  0x10   :  { %25 = vsyncpa [#allocation5], 0 }
  0x11   :  { %27 = vsyncpa [#allocation5 + $0x1], 0  ;;  %s2297_s1 = smov 0   ;;  %s2299_s22 = smov 0  }
  0x12   :  { %s2301_s23 = smov 0   ;;  %s2303_s24 = smov 0  }
  0x13   :  { %s2305_s2 = smov 0   ;;  %s2307_s25 = smov 0  }
  0x14   :  { %s2309_s3 = smov 0   ;;  %s2311_s26 = smov 0  }
  0x15 LB: > { %2680 = sst [smem:[#allocation7_spill]] %s2151_s1  ;;  %s1812_s27 = sadd.s32 4294967295, %s2179_s26   ;;  %s2179_s26 = sphi %s2311_s26, %s33_s26   ;;  %s2175_s3 = sphi %s2309_s3, %s2735_s3   ;;  %s2171_s25 = sphi %s2307_s25, %s2734_s25   ;;  %s2167_s2 = sphi %s2305_s2, %s2733_s2   ;;  %s2163_s24 = sphi %s2303_s24, %s2732_s24   ;;  %s2159_s23 = sphi %s2301_s23, %s2731_s23   ;;  %s2155_s22 = sphi %s2299_s22, %s2737_s22   ;;  %s2151_s1 = sphi %s2297_s1, %s2736_s1  }
  0x16   : > { %2681 = sst [smem:[#allocation8_spill]] %s2159_s23  ;;  %s1813_s28 = sadd.s32 4294967294, %s2179_s26  }
  0x17   : > { %2682 = sst [smem:[#allocation9_spill]] %s2163_s24  ;;  %s42_s4 = sadd.s32 1, %s2171_s25 }
  0x18   : > { %2683 = sst [smem:[#allocation10_spill]] %s2167_s2  ;;  %p43_p0 = scmp.ge.s32.totalorder %s42_s4, 2 }
  0x19   : > { %2684 = sst [smem:[#allocation11_spill]] %s2171_s25  ;;  %s45_s29 = sadd.s32 1, %s2175_s3 }
  0x1a   : > { %2685 = sst [smem:[#allocation12_spill]] %s2175_s3  ;;  %p552_p1 = scmp.ne.s32.totalorder %s2159_s23, %s2155_s22 }
  0x1b   : > { %2686 = sst [smem:[#allocation13_spill]] %s2179_s26  ;;  %p553_p2 = scmp.eq.s32.totalorder %s1812_s27, 3 }
  0x1c   : > { %s2739_s4 = smov (%p43_p0, %s42_s4), 0  ;;  %s2741_s29 = smov (!%p43_p0, %s45_s29), %s2175_s3 }
  0x1d   : > { %2687 = sst [smem:[#allocation14_spill]] %s2739_s4  ;;  %p2346_p3 = por %p553_p2, %p552_p1 }
  0x1e   : > { %p558_p4 = scmp.ne.s32.totalorder %s2155_s22, %s2151_s1  ;;  %p47_p5 = scmp.ge.s32.totalorder %s2741_s29, 2 }
  0x1f   : > { %s2688_s30 = scalar_select %p2346_p3, 1, 0 }
  0x20   : > { %p559_p6 = scmp.eq.s32.totalorder %s1813_s28, 3  ;;  %p1816_p7 = scmp.ge.s32.totalorder %s2179_s26, 1 }
  0x21   : > { %2689 = sst [smem:[#allocation15_spill]] %s2688_s30  ;;  %p688_p8 = scmp.lt.s32.totalorder %s2179_s26, 5 }
  0x22   : > { %s2743_s29 = smov (%p47_p5, %s2741_s29), 0  ;;  %p2356_p9 = por %p559_p6, %p558_p4 }
  0x23   : > { %2690 = sst [smem:[#allocation16_spill]] %s2743_s29  ;;  %p689_p10 = pnand %p1816_p7, %p688_p8 }
  0x24   : > { %s2691_s0 = scalar_select %p2356_p9, 1, 0 }
  0x25   : > { %s539_s21 = ssub.s32 %s2175_s3, %s2743_s29  ;;  %s542_s27 = sadd.s32 1, %s2159_s23 }
  0x26   : > { %2692 = sst [smem:[#allocation17_spill]] %s2691_s0  ;;  %p540_p11 = scmp.eq.s32.totalorder %s539_s21, 0 }
  0x27   : > { %692 = sbr.rel (%p689_p10) target bundleno = 3214 (0xc8e), region = 100  ;;  %p791_p12 = scmp.lt.s32.totalorder (!%p689_p10), %s2167_s2, 1 }
  0x28   : > { %s2364_s4 = scalar_select %p540_p11, %s2159_s23, %s542_s27  }
  0x29   : > { %p798_p13 = scmp.lt.s32.totalorder (!%p689_p10), %s2163_s24, 1  ;;  %s2695_s1 = sld [smem:[#allocation19_spill]] (!%p689_p10) }
  0x2a   : > { %2693 = sst [smem:[#allocation18_spill]] %s2364_s4  ;;  %s2702_s14 = sand.u32 (!%p689_p10), 1, %s2155_s22  }
  0x2b   : > { %s2696_s19 = sld [smem:[#allocation23_spill]] (!%p689_p10)  ;;  %s2439_s15 = scalar_lea.vmem (!%p689_p10), [#allocation4], %s2702_s14 }
  0x2c   : > { %s2370_s25 = scalar_select %p791_p12, %s2167_s2, 1 }
  0x2d   : > { %s2373_s0 = scalar_select %p798_p13, %s2163_s24, 1 }
  0x2e   : > { %s1817_s21 = sshll.u32 %s2370_s25, 3  ;;  %s2697_s6 = sld [smem:[#allocation24_spill]] }
  0x2f   : > { %s794_s26 = scalar_lea.vmem %s2695_s1, %s1817_s21  ;;  %s1866_s20 = sshll.u32 %s2373_s0, 4 }
  0x30   : > { %s2699_s10 = sld [smem:[#allocation26_spill]]  ;;  %s835_s23 = scalar_lea.vmem %s2642_s13, %s2373_s0 }
  0x31   : > { %s2387_s17 = scalar_lea.vmem %s2696_s19, %s1866_s20  ;;  %s2700_s30 = sld [smem:[#allocation27_spill]] }
  0x32   : > { %s2703_s24 = sld [smem:[#allocation9_spill]] }
  0x34   : > { %s2396_s28 = scalar_lea.vmem %s2697_s6, %s1866_s20  ;;  %s1869_s6 = sshll.u32 %s2373_s0, 5 }
  0x35   : > { %s2427_s21 = scalar_lea.vmem %s2641_s12, %s1869_s6 }
  0x36   : > { %s2413_s18 = scalar_lea.vmem %s2699_s10, %s1866_s20  ;;  %s2701_s10 = sld [smem:[#allocation28_spill]] }
  0x37   : > { %s838_s3 = scalar_lea.vmem %s2700_s30, %s2373_s0 }
  0x38   : > { %p1826_p0 = scmp.ne.s32.totalorder %s2703_s24, 0 }
  0x39   : > { %s2704_s24 = sld [smem:[#allocation21_spill]] (!%p1826_p0) }
  0x3a   : > { %846 = sbr.rel (%p1826_p0) target bundleno = 373 (0x175), region = 104  ;;  %s2705_s29 = sld [smem:[#allocation22_spill]] (!%p1826_p0) }
  0x3c   : > { %s841_s9 = scalar_lea.vmem %s2701_s10, %s2373_s0 }
  0x3f   : > { %v847_v0 = vld [vmem:[%s794_s26] sm:$0xff]  ;;  %vm850_vm0 = vcmask 261120  }
  0x40   : > { %v851_v1 = vsel %vm850_vm0, %v847_v0, 0.0  ;;  %v1827_v11 = vld [vmem:[%s2704_s24] ss:$0 sm:$0xff] }
  0x41   : > { %852 = vadd.xlane.f32.xlu0 %v851_v1  ;;  %v1828_v13 = vld [vmem:[%s2705_s29] ss:$0 sm:$0xff] }
  0xca   : > { %v853_v2 = vpop.xlane.xlu0 %852 }
  0xcb   : > { %v855_v3 = vmul.f32 0.03125, %v853_v2 }
  0xcd   : > { %v856_v4 = vsub.f32 %v847_v0, %v855_v3 }
  0xcf   : > { %v857_v5 = vmul.f32 %v856_v4, %v856_v4 }
  0xd1   : > { %v858_v6 = vsel %vm850_vm0, %v857_v5, 0.0 }
  0xd2   : > { %859 = vadd.xlane.f32.xlu0 %v858_v6 }
 0x15b   : > { %v860_v7 = vpop.xlane.xlu0 %859 }
 0x15c   : > { %v861_v8 = vmul.f32 0.03125, %v860_v7 }
 0x15e   : > { %v862_v9 = vadd.f32 1e-12, %v861_v8 }
 0x160   : > { %2055 = vrsqrt.f32 %v862_v9 }
 0x16d   : > { %v2056_v10 = vpop.eup %2055 }
 0x16e   : > { %v864_v12 = vmul.f32 %v2056_v10, %v856_v4 }
 0x170   : > { %v871_v14 = vmul.f32 %v1827_v11, %v864_v12 }
 0x172   : > { %v878_v15 = vadd.f32 %v1828_v13, %v871_v14 }
 0x174   : > { %879 = vst.msk [vmem:[#allocation2] sm:$0xff] %vm850_vm0, %v878_v15 }
 0x175 PF: > { %v2057_v16 = vld [vmem:[%s2387_s17 + $0x8] sm:$0xff]   ;;  %v2181_v17 = vmov 0.0   ;;  %v2058_v18 = vld [vmem:[%s2387_s17] sm:$0xff]   ;;  %vm2182_vm1 = vmmov 0   ;;  %vm906_vm2 = vcmask 261120   ;;  %s2706_s1 = scalar_lea.vmem %s2634_s5, %s2373_s0  ;;  %s2183_s4 = smov 112  }
 0x176   : > { %1898 = vmatprep.subr.bf16.mxu0 %v2181_v17  ;;  %1906 = vmatprep.subr.bf16.mxu1 %v2181_v17  ;;  %v1829_v21 = vld [vmem:[%s2706_s1] ss:$0 sm:$0xff]  ;;  %s2184_s2 = smov 96   ;;  %s2185_s19 = smov 80   ;;  %vm954_vm3 = vcmask 130048   ;;  %vm1009_vm4 = vcmask 64512  }
 0x177   : > { %1899 = vmatpush3.bf16.msra.mxu0 %v2057_v16  ;;  %1902 = vmatprep.mubr.msk.bf16.mxu0 %vm2182_vm1, %v2181_v17  ;;  %s2707_s14 = sld [smem:[#allocation20_spill]]  ;;  %s2187_s10 = smov 48   ;;  %vm1027_vm5 = vcmask 1043456   ;;  %v2059_v6 = vld [vmem:[%s2396_s28 + $0x8] sm:$0xff]   ;;  %v2060_v7 = vld [vmem:[%s2396_s28] sm:$0xff]   ;;  %vm1188_vm6 = vcmask 261248  }
 0x178   : > { %1900 = vmatprep.subr.bf16.mxu0 %v2181_v17  ;;  %1908 = vmatprep.mubr.msk.bf16.mxu1 %vm2182_vm1, %v2181_v17  ;;  %s2188_s24 = smov 16   ;;  %s2709_s30 = scalar_lea.vmem %s2636_s7, %s2373_s0  ;;  %vm1401_vm7 = vcmask 523264  }
 0x179   : > { %s2710_s27 = scalar_lea.vmem %s2637_s8, %s2373_s0  ;;  %s2713_s16 = scalar_lea.vmem %s2640_s11, %s2373_s0 }
 0x17a   : > { %s2716_s26 = sld [smem:[#allocation9_spill]] }
 0x17b   : > { %v2457_v19 = vld [vmem:[#allocation2] sm:$0xff]  ;;  %1901 = vmatpush3.bf16.msra.mxu0 %v2058_v18 }
 0x17c   : > { %v882_v20 = vpack.c.bf16 %v2457_v19, %v2457_v19  ;;  %1912 = vmatprep.subr.bf16.mxu0 %v2181_v17 }
 0x17d   : > { %s2708_s6 = scalar_lea.vmem %s2707_s14, %s2370_s25  ;;  %s2186_s25 = smov 64  }
 0x17e   : > { %1903 = vmatmul.mubr.msk.bf16.vlgmr.msra.gmra.mxu0 %vm906_vm2, %v882_v20  ;;  %v1834_v34 = vld [vmem:[%s2708_s6] ss:$0 sm:$0xff] }
 0x17f   : > { %1914 = vmatprep.mubr.msk.bf16.mxu0 %vm2182_vm1, %v2181_v17 }
 0x180   : > { %p1856_p1 = scmp.ne.s32.totalorder %s2716_s26, 1 }
 0x181   : > { %s2717_s17 = sld [smem:[#allocation29_spill]] (!%p1856_p1) }
 0x182   : > { %s2718_s1 = sld [smem:[#allocation31_spill]] (!%p1856_p1) }
 0x23e   : > { %v944_v22 = vpop.f32.mrf.mxu0 }
 0x23f   : > { %v945_v23 = vadd.f32 %v1829_v21, %v944_v22  ;;  %v1838_v21 = vld [vmem:[%s2709_s30] ss:$0 sm:$0xff] }
 0x240   : > { %v1904_v24 = vpop.f32.mrf.mxu0 }
 0x241   : > { %v950_v25 = vpack.c.bf16 %v945_v23, %v945_v23 }
 0x242   : > { %v947_v26 = vpop.f32.mrf.mxu0 }
 0x243   : > { %1072 = vrot.lane.b32.xlu1 %v950_v25, %s2183_s4  ;;  %952 = vrot.lane.b32.xlu0 %v950_v25, %s2184_s2  ;;  %s2719_s4 = smov (!%p1856_p1), %s2718_s1 }
 0x244   : > { %v1905_v27 = vpop.f32.mrf.mxu0 }
 0x247   : > { %1074 = vrot.lane.b32.xlu0 %v950_v25, %s2185_s19 }
 0x2b5   : > { %v953_v28 = vpop.permute.xlu0 %952  ;;  %v1073_v32 = vpop.permute.xlu1 %1072 }
 0x2b6   : > { %v959_v29 = vsel %vm954_vm3, %v953_v28, 0 }
 0x2b7   : > { %1907 = vmatpush3.bf16.xpose.msra.mxu1 %v959_v29 }
 0x2b8   : > { %1918 = vmatprep.subr.bf16.mxu1 %v2181_v17 }
 0x2b9   : > { %v1075_v30 = vpop.permute.xlu0 %1074 }
 0x2ba   : > { %v1080_v31 = vsel %vm954_vm3, %v1075_v30, 0 }
 0x2be   : > { %1909 = vmatmul.mubr.msk.bf16.vlgmr.msra.gmra.mxu1 %vm954_vm3, %v950_v25 }
 0x2bf   : > { %1919 = vmatpush3.bf16.xpose.msra.mxu1 %v1080_v31  ;;  %1920 = vmatprep.mubr.msk.bf16.mxu1 %vm2182_vm1, %v2181_v17 }
 0x2c0   : > { %1930 = vmatprep.subr.bf16.mxu1 %v2181_v17 }
 0x2c6   : > { %1921 = vmatmul.mubr.msk.bf16.vlgmr.msra.gmra.mxu1 %vm954_vm3, %v1073_v32 }
 0x2c7   : > { %1934 = vmatprep.mubr.msk.bf16.mxu1 %vm2182_vm1, %v2181_v17  ;;  %1931 = vmatpush3.bf16.msra.mxu1 %v2059_v6 }
 0x2c8   : > { %1932 = vmatprep.subr.bf16.mxu1 %v2181_v17 }
 0x2cb   : > { %1933 = vmatpush3.bf16.msra.mxu1 %v2060_v7 }
 0x2cc   : > { %1946 = vmatprep.subr.bf16.mxu1 %v2181_v17 }
 0x37e   : > { %v995_v33 = vpop.f32.mrf.mxu1 }
 0x37f   : > { %v1001_v35 = vmul.f32 0.25, %v995_v33 }
 0x380   : > { %v1910_v36 = vpop.f32.mrf.mxu1 }
 0x381   : > { %v1008_v37 = vadd.f32 %v1834_v34, %v1001_v35  ;;  %v2062_v35 = vld [vmem:[%s2413_s18] sm:$0xff]  }
 0x382   : > { %v998_v38 = vpop.f32.mrf.mxu1 }
 0x383   : > { %v1010_v39 = vsel %vm1009_vm4, %v1008_v37, -inf }
 0x384   : > { %1011 = vmax.xlane.f32.xlu1 %v1010_v39  ;;  %v1911_v40 = vpop.f32.mrf.mxu1  ;;  %v1842_v39 = vld [vmem:[%s2710_s27] ss:$0 sm:$0xff] }
 0x386   : > { %v1116_v41 = vpop.f32.mrf.mxu1 }
 0x387   : > { %v1122_v42 = vmul.f32 0.25, %v1116_v41 }
 0x388   : > { %v1922_v43 = vpop.f32.mrf.mxu1 }
 0x389   : > { %v1123_v44 = vadd.f32 %v1834_v34, %v1122_v42  ;;  %v2061_v34 = vld [vmem:[%s2413_s18 + $0x8] sm:$0xff]   ;;  %s2711_s18 = sld [smem:[#allocation25_spill]] }
 0x38a   : > { %v1119_v45 = vpop.f32.mrf.mxu1 }
 0x38b   : > { %v1124_v46 = vsel %vm1009_vm4, %v1123_v44, -inf  ;;  %v2063_v45 = vld [vmem:[%s2427_s21 + $0x18] sm:$0xff]  }
 0x38c   : > { %1125 = vmax.xlane.f32.xlu0 %v1124_v46  ;;  %v1923_v47 = vpop.f32.mrf.mxu1  ;;  %v2064_v46 = vld [vmem:[%s2427_s21 + $0x10] sm:$0xff]  }
 0x38d   : > { %v2065_v47 = vld [vmem:[%s2427_s21 + $0x8] sm:$0xff]  }
 0x38f   : > { %s2712_s2 = scalar_lea.vmem %s2711_s18, %s2373_s0 }
 0x390   : > { %v1843_v41 = vld [vmem:[%s2712_s2] ss:$0 sm:$0xff] }
 0x40d   : > { %v1012_v48 = vpop.xlane.xlu1 %1011 }
 0x40e   : > { %v1013_v49 = vsub.f32 %v1008_v37, %v1012_v48  ;;  %v2066_v48 = vld [vmem:[%s2427_s21] sm:$0xff]  }
 0x410   : > { %v1014_v50 = vmul.f32 1.442695, %v1013_v49  ;;  %v1844_v49 = vld [vmem:[%s2713_s16] ss:$0 sm:$0xff]  ;;  %s2720_s16 = sld [smem:[#allocation30_spill]] (!%p1856_p1) }
 0x412   : > { %2067 = vpow2.f32 %v1014_v50 }
 0x415   : > { %v1126_v51 = vpop.xlane.xlu0 %1125 }
 0x416   : > { %v1127_v52 = vsub.f32 %v1123_v44, %v1126_v51 }
 0x418   : > { %v1128_v53 = vmul.f32 1.442695, %v1127_v52 }
 0x41a   : > { %2069 = vpow2.f32 %v1128_v53 }
 0x41f   : > { %v2068_v54 = vpop.eup %2067 }
 0x420   : > { %v1016_v55 = vsel %vm1009_vm4, %v2068_v54, 0.0 }
 0x421   : > { %1017 = vadd.xlane.f32.xlu0 %v1016_v55 }
 0x427   : > { %v2070_v56 = vpop.eup %2069 }
 0x428   : > { %v1130_v57 = vsel %vm1009_vm4, %v2070_v56, 0.0 }
 0x429   : > { %1131 = vadd.xlane.f32.xlu1 %v1130_v57 }
 0x437   : > { %1022 = vrot.lane.b32.xlu0 %v950_v25, %s2186_s25 }
 0x43a   : > { %1136 = vrot.lane.b32.xlu1 %v950_v25, %s2187_s10 }
 0x4aa   : > { %v1018_v58 = vpop.xlane.xlu0 %1017 }
 0x4ab   : > { %2071 = vrcp.f32 %v1018_v58 }
 0x4ae   : > { %v1023_v59 = vpop.permute.xlu0 %1022 }
 0x4af   : > { %v1029_v60 = vsel %vm1027_vm5, %v1023_v59, 0 }
 0x4b0   : > { %1913 = vmatpush3.bf16.msra.mxu0 %v1029_v60  ;;  %v1848_v60 = vld [vmem:[%s835_s23] ss:$0 sm:$0xff]  ;;  %s2721_s23 = sld [smem:[#allocation32_spill]] (!%p1856_p1) }
 0x4b1   : > { %1924 = vmatprep.subr.bf16.mxu0 %v2181_v17 }
 0x4b2   : > { %v1132_v61 = vpop.xlane.xlu1 %1131 }
 0x4b3   : > { %2073 = vrcp.f32 %v1132_v61 }
 0x4b6   : > { %v1137_v0 = vpop.permute.xlu1 %1136 }
 0x4b7   : > { %v1142_v2 = vsel %vm1027_vm5, %v1137_v0, 0 }
 0x4b8   : > { %v2072_v62 = vpop.eup %2071 }
 0x4b9   : > { %v1020_v63 = vmul.f32 %v2072_v62, %v2068_v54 }
 0x4bb   : > { %v1021_v1 = vpack.c.bf16 %v1020_v63, %v1020_v63 }
 0x4bd   : > { %1915 = vmatmul.mubr.msk.bf16.vlgmr.msra.gmra.mxu0 %vm1009_vm4, %v1021_v1 }
 0x4be   : > { %1925 = vmatpush3.bf16.msra.mxu0 %v1142_v2  ;;  %1926 = vmatprep.mubr.msk.bf16.mxu0 %vm2182_vm1, %v2181_v17 }
 0x4bf   : > { %1938 = vmatprep.subr.bf16.mxu0 %v2181_v17 }
 0x4c0   : > { %v2074_v3 = vpop.eup %2073 }
 0x4c1   : > { %v1134_v4 = vmul.f32 %v2074_v3, %v2070_v56 }
 0x4c3   : > { %v1135_v5 = vpack.c.bf16 %v1134_v4, %v1134_v4 }
 0x4c5   : > { %1927 = vmatmul.mubr.msk.bf16.vlgmr.msra.gmra.mxu0 %vm1009_vm4, %v1135_v5 }
 0x4c6   : > { %1942 = vmatprep.mubr.msk.bf16.mxu0 %vm2182_vm1, %v2181_v17  ;;  %1939 = vmatpush3.bf16.msra.mxu0 %v2061_v34 }
 0x4c7   : > { %1940 = vmatprep.subr.bf16.mxu0 %v2181_v17 }
 0x4ca   : > { %1941 = vmatpush3.bf16.msra.mxu0 %v2062_v35 }
 0x57d   : > { %v1065_v8 = vpop.f32.mrf.mxu0 }
 0x57e   : > { %1071 = vst.msk [vmem:[#allocation3] sm:$0xff] %vm954_vm3, %v1065_v8 }
 0x57f   : > { %v1916_v9 = vpop.f32.mrf.mxu0 }
 0x581   : > { %v1068_v10 = vpop.f32.mrf.mxu0 }
 0x583   : > { %v1917_v11 = vpop.f32.mrf.mxu0 }
 0x585   : > { %v1178_v12 = vpop.f32.mrf.mxu0 }
 0x586   : > { %1185 = vrot.lane.b32.xlu1 %v1178_v12, %s2188_s24 }
 0x587   : > { %v1928_v13 = vpop.f32.mrf.mxu0 }
 0x588   : > { %v1854_v13 = vld [vmem:[%s838_s3] ss:$0 sm:$0xff] }
 0x589   : > { %v1181_v14 = vpop.f32.mrf.mxu0 }
 0x58b   : > { %v1929_v15 = vpop.f32.mrf.mxu0 }
 0x58c   : > { %v1855_v15 = vld [vmem:[%s841_s9] ss:$0 sm:$0xff] }
 0x5f8   : > { %v1186_v16 = vpop.permute.xlu1 %1185 }
 0x5f9   : > { %1189 = vst.msk [vmem:[#allocation3] sm:$0xff] %vm1188_vm6, %v1186_v16 }
 0x600   : > { %v1190_v18 = vld [vmem:[#allocation3] sm:$0xff] }
 0x601   : > { %v1191_v20 = vpack.c.bf16 %v1190_v18, %v1190_v18 }
 0x603   : > { %1935 = vmatmul.mubr.msk.bf16.vlgmr.msra.gmra.mxu1 %vm906_vm2, %v1191_v20 }
 0x604   : > { %1954 = vmatprep.mubr.msk.bf16.mxu1 %vm2182_vm1, %v2181_v17  ;;  %1947 = vmatpush3.bf16.msra.mxu1 %v2063_v45 }
 0x605   : > { %1948 = vmatprep.subr.bf16.mxu1 %v2181_v17 }
 0x608   : > { %1949 = vmatpush3.bf16.msra.mxu1 %v2064_v46 }
 0x609   : > { %1950 = vmatprep.subr.bf16.mxu1 %v2181_v17 }
 0x60c   : > { %1951 = vmatpush3.bf16.msra.mxu1 %v2065_v47 }
 0x60d   : > { %1952 = vmatprep.subr.bf16.mxu1 %v2181_v17 }
 0x610   : > { %1953 = vmatpush3.bf16.msra.mxu1 %v2066_v48 }
 0x6c3   : > { %v1252_v22 = vpop.f32.mrf.mxu1 }
 0x6c4   : > { %v1253_v23 = vadd.f32 %v1838_v21, %v1252_v22 }
 0x6c5   : > { %v1936_v24 = vpop.f32.mrf.mxu1 }
 0x6c6   : > { %v1258_v25 = vadd.f32 %v1253_v23, %v2457_v19 }
 0x6c7   : > { %v1255_v26 = vpop.f32.mrf.mxu1 }
 0x6c8   : > { %v1261_v27 = vsel %vm906_vm2, %v1258_v25, 0.0 }
 0x6c9   : > { %1262 = vadd.xlane.f32.xlu0 %v1261_v27  ;;  %v1937_v28 = vpop.f32.mrf.mxu1 }
 0x752   : > { %v1263_v29 = vpop.xlane.xlu0 %1262 }
 0x753   : > { %v1265_v30 = vmul.f32 0.03125, %v1263_v29 }
 0x755   : > { %v1266_v31 = vsub.f32 %v1258_v25, %v1265_v30 }
 0x757   : > { %v1267_v32 = vmul.f32 %v1266_v31, %v1266_v31 }
 0x759   : > { %v1268_v33 = vsel %vm906_vm2, %v1267_v32, 0.0 }
 0x75a   : > { %1269 = vadd.xlane.f32.xlu1 %v1268_v33 }
 0x7e3   : > { %v1270_v19 = vpop.xlane.xlu1 %1269 }
 0x7e4   : > { %v1271_v36 = vmul.f32 0.03125, %v1270_v19 }
 0x7e6   : > { %v1272_v37 = vadd.f32 1e-12, %v1271_v36 }
 0x7e8   : > { %2075 = vrsqrt.f32 %v1272_v37 }
 0x7f5   : > { %v2076_v38 = vpop.eup %2075 }
 0x7f6   : > { %v1274_v40 = vmul.f32 %v2076_v38, %v1266_v31 }
 0x7f8   : > { %v1281_v42 = vmul.f32 %v1842_v39, %v1274_v40 }
 0x7fa   : > { %v1288_v43 = vadd.f32 %v1843_v41, %v1281_v42 }
 0x7fc   : > { %v1289_v44 = vpack.c.bf16 %v1288_v43, %v1288_v43 }
 0x7fe   : > { %1943 = vmatmul.mubr.msk.bf16.vlgmr.msra.gmra.mxu0 %vm906_vm2, %v1289_v44 }
 0x8be   : > { %v1350_v50 = vpop.f32.mrf.mxu0 }
 0x8bf   : > { %v1351_v51 = vadd.f32 %v1844_v49, %v1350_v50 }
 0x8c0   : > { %v1944_v52 = vpop.f32.mrf.mxu0 }
 0x8c1   : > { %v1357_v53 = vmul.f32 0.70710677, %v1351_v51  ;;  %v1356_v57 = vmul.f32 0.5, %v1351_v51 }
 0x8c2   : > { %v1353_v54 = vpop.f32.mrf.mxu0 }
 0x8c3   : > { %2077 = verf.f32 %v1357_v53 }
 0x8c4   : > { %v1945_v55 = vpop.f32.mrf.mxu0 }
 0x8d0   : > { %v2078_v56 = vpop.eup %2077 }
 0x8d1   : > { %v1359_v58 = vadd.f32 1.0, %v2078_v56 }
 0x8d3   : > { %v1360_v59 = vmul.f32 %v1359_v58, %v1356_v57 }
 0x8d5   : > { %v1361_v17 = vpack.c.bf16 %v1360_v59, %v1360_v59 }
 0x8d7   : > { %1955 = vmatmul.mubr.msk.bf16.vlgmr.msra.gmra.mxu1 %vm1401_vm7, %v1361_v17 }
 0x997   : > { %v1439_v61 = vpop.f32.mrf.mxu1 }
 0x998   : > { %v1440_v62 = vadd.f32 %v1848_v60, %v1439_v61 }
 0x999   : > { %v1956_v63 = vpop.f32.mrf.mxu1 }
 0x99a   : > { %v1445_v0 = vadd.f32 %v1440_v62, %v1288_v43 }
 0x99b   : > { %v1442_v1 = vpop.f32.mrf.mxu1 }
 0x99c   : > { %v1448_v2 = vsel %vm906_vm2, %v1445_v0, 0.0 }
 0x99d   : > { %1449 = vadd.xlane.f32.xlu0 %v1448_v2  ;;  %v1957_v3 = vpop.f32.mrf.mxu1 }
 0xa26   : > { %v1450_v4 = vpop.xlane.xlu0 %1449 }
 0xa27   : > { %v1451_v5 = vmul.f32 0.03125, %v1450_v4 }
 0xa29   : > { %v1452_v6 = vsub.f32 %v1445_v0, %v1451_v5 }
 0xa2b   : > { %v1453_v7 = vmul.f32 %v1452_v6, %v1452_v6 }
 0xa2d   : > { %v1454_v8 = vsel %vm906_vm2, %v1453_v7, 0.0 }
 0xa2e   : > { %1455 = vadd.xlane.f32.xlu0 %v1454_v8 }
 0xab7   : > { %v1456_v9 = vpop.xlane.xlu0 %1455 }
 0xab8   : > { %v1457_v10 = vmul.f32 0.03125, %v1456_v9 }
 0xaba   : > { %v1458_v11 = vadd.f32 1e-12, %v1457_v10 }
 0xabc   : > { %2079 = vrsqrt.f32 %v1458_v11 }
 0xac9   : > { %v2080_v12 = vpop.eup %2079 }
 0xaca   : > { %v1460_v14 = vmul.f32 %v2080_v12, %v1452_v6 }
 0xacc   : > { %v1467_v16 = vmul.f32 %v1854_v13, %v1460_v14  ;;  %1479 = sbr.rel (%p1856_p1) target bundleno = 3188 (0xc74), region = 108 }
 0xace   : > { %v1474_v18 = vadd.f32 %v1855_v15, %v1467_v16 }
 0xad0   : > { %1475 = vst.msk [vmem:[#allocation2] sm:$0xff] %vm906_vm2, %v1474_v18 }
 0xad1   : > { %v2081_v20 = vld [vmem:[%s2717_s17 + $0x8] sm:$0xff]   ;;  %v2189_v21 = vmov 0.0   ;;  %v2082_v22 = vld [vmem:[%s2717_s17] sm:$0xff]   ;;  %vm2190_vm8 = vmmov 0   ;;  %v1480_v23 = vpack.c.bf16 %v1474_v18, %v1474_v18 }
 0xad2   : > { %1958 = vmatprep.subr.bf16.mxu0 %v2189_v21  ;;  %1966 = vmatprep.subr.bf16.mxu1 %v2189_v21  ;;  %v2083_v24 = vld [vmem:[%s2718_s1 + $0x8] sm:$0xff]   ;;  %v2084_v25 = vld [vmem:[%s2719_s4] sm:$0xff]  }
 0xad3   : > { %1959 = vmatpush3.bf16.msra.mxu0 %v2081_v20  ;;  %1962 = vmatprep.mubr.msk.bf16.mxu0 %vm2190_vm8, %v2189_v21  ;;  %v1485_v26 = vld [vmem:[%s2720_s16] sm:$0x1] }
 0xad4   : > { %1960 = vmatprep.subr.bf16.mxu0 %v2189_v21  ;;  %1970 = vmatprep.mubr.msk.bf16.mxu1 %vm2190_vm8, %v2189_v21  ;;  %v1547_v34 = vld [vmem:[%s2721_s23] sm:$0x1] }
 0xad5   : > { %1967 = vmatpush3.bf16.msra.mxu1 %v2083_v24 }
 0xad6   : > { %1968 = vmatprep.subr.bf16.mxu1 %v2189_v21 }
 0xad7   : > { %1961 = vmatpush3.bf16.msra.mxu0 %v2082_v22 }
 0xad9   : > { %1969 = vmatpush3.bf16.msra.mxu1 %v2084_v25 }
 0xada   : > { %1963 = vmatmul.mubr.msk.bf16.vlgmr.msra.gmra.mxu0 %vm906_vm2, %v1480_v23 }
 0xb9a   : > { %v1535_v27 = vpop.f32.mrf.mxu0 }
 0xb9b   : > { %v1536_v28 = vadd.f32 %v1535_v27, %v1485_v26 }
 0xb9c   : > { %v1964_v29 = vpop.f32.mrf.mxu0 }
 0xb9d   : > { %2085 = vtanh.f32 %v1536_v28 }
 0xb9e   : > { %v1538_v30 = vpop.f32.mrf.mxu0 }
 0xba0   : > { %v1965_v31 = vpop.f32.mrf.mxu0 }
 0xbaa   : > { %v2086_v32 = vpop.eup %2085 }
 0xbab   : > { %v1542_v33 = vpack.c.bf16 %v2086_v32, %v2086_v32 }
 0xbad   : > { %1971 = vmatmul.mubr.msk.bf16.vlgmr.msra.gmra.mxu1 %vm906_vm2, %v1542_v33 }
 0xc6d   : > { %v1597_v35 = vpop.f32.mrf.mxu1 }
 0xc6e   : > { %v1598_v19 = vadd.f32 %v1597_v35, %v1547_v34 }
 0xc6f   : > { %v1972_v36 = vpop.f32.mrf.mxu1 }
 0xc70   : > { %1603 = vst [vmem:[%s2439_s15] sm:$0x1] %v1598_v19 }
 0xc71   : > { %v1600_v37 = vpop.f32.mrf.mxu1 }
 0xc73   : > { %v1973_v38 = vpop.f32.mrf.mxu1 }
 0xc74 PF: > { %s2722_s6 = sld [smem:[#allocation10_spill]]  ;;  %s1617_s3 = sshll.u32 %s2439_s15, 4  ;;  %s1618_s3 = int_to_ptr.vmem [resolvable:$true] %s1617_s3 }
 0xc75   : > { %s2724_s26 = sld [smem:[#allocation33_spill]]  ;;  %s2726_s27 = sand.u32 1, %s2155_s22  }
 0xc76   : > { %s1605_s9 = scalar_lea.sflag [#allocation5], %s2726_s27  ;;  %s2087_s0 = scalar_lea.vmem %s1618_s3, 16 }
 0xc77   : > { %p2088_p2 = scmp.ne.s32.totalorder %s1618_s3, %s2087_s0  ;;  %s2191_s1 = smov [#allocation4]  }
 0xc78   : > { %s2091_s18 = sshll.u32 %s2191_s1, 4  ;;  %s2092_s18 = int_to_ptr.vmem [resolvable:$false] %s2091_s18 }
 0xc79   : > { %p2089_p4 = pnand %p2088_p2, %p2346_p3  ;;  %s2093_s2 = scalar_lea.vmem %s2092_s18, 32 }
 0xc7a   : > { %s1863_s10 = sshll.u32 %s2722_s6, 4  ;;  %p2094_p6 = scmp.lt.s32.totalorder %s1618_s3, %s2092_s18 }
 0xc7b   : > { %s2725_s30 = smov %s2724_s26  ;;  %s1615_s29 = scalar_lea.hbm %s2724_s26, %s1863_s10 }
 0xc7c   : > { %p2090_p5 = pneg %p2089_p4  ;;  %p2095_p7 = scmp.lt.s32.totalorder %s2093_s2, %s2087_s0 }
 0xc7e   : > { %p2096_p8 = por %p2095_p7, %p2094_p6 }
 0xc80   : > { %p2097_p10 = pnand %p2096_p8, %p2090_p5 }
 0xc82   : > { %2100 = shalt.err (!%p2097_p10)
}
 0xc83   : > { %s2101_s19 = scalar_lea.hbm %s1615_s29, 16  ;;  %s2105_s16 = scalar_lea.hbm %s2725_s30, 32 }
 0xc84   : > { %p2102_p11 = scmp.ne.s32.totalorder %s1615_s29, %s2101_s19  ;;  %p2106_p0 = scmp.lt.s32.totalorder %s1615_s29, %s2725_s30 }
 0xc85   : > { %p2107_p1 = scmp.lt.s32.totalorder %s2105_s16, %s2101_s19 }
 0xc86   : > { %p2103_p12 = pnand %p2102_p11, %p2346_p3 }
 0xc87   : > { %p2108_p2 = por %p2107_p1, %p2106_p0 }
 0xc88   : > { %p2104_p13 = pneg %p2103_p12 }
 0xc8a   : > { %p2109_p4 = pnand %p2108_p2, %p2104_p13 }
 0xc8c   : > { %2112 = shalt.err (!%p2109_p4)
}
 0xc8d   : > { %1974 = dma.vmem_to_hbm [thread:$0]  (%p2346_p3), %s1618_s3, 16, %s1615_s29, %s1605_s9  }
 0xc8e PF: > { %s2727_s23 = sld [smem:[#allocation13_spill]] }
 0xc8f   : > { %s2728_s6 = sld [smem:[#allocation7_spill]] }
 0xc94   : > { %p1980_p5 = scmp.ge.s32.totalorder %s2727_s23, 2 }
 0xc95   : > { %s1629_s24 = sand.u32 1, %s2728_s6  }
 0xc96   : > { %p1977_p6 = pnand %p1980_p5, %p2356_p9  ;;  %s1630_s28 = scalar_lea.sflag [#allocation5], %s1629_s24 }
 0xc98   : > { %p1978_p7 = pneg %p1977_p6 }
 0xc9a   : > { %2146 = dma.done.wait (%p1978_p7), %s1630_s28, 16  }
 0xc9b   : > { %2148 = vsyncadd (%p1978_p7), %s1630_s28, 4294967280  ;;  %s33_s26 = sadd.s32 1, %s2727_s23   ;;  %s2730_s27 = sld [smem:[#allocation8_spill]] }
 0xc9c   : > { %p30_p8 = scmp.ge.s32.totalorder %s33_s26, 6   ;;  %s2731_s23 = sld [smem:[#allocation18_spill]] }
 0xc9d   : > { %s2732_s24 = sld [smem:[#allocation11_spill]]  ;;  %s2736_s1 = smov %s2155_s22 }
 0xc9e   : > { %s2733_s2 = sld [smem:[#allocation12_spill]]  ;;  %32 = sbr.rel (!%p30_p8) target bundleno = 21 (0x15), region = 182 }
 0xc9f   : > { %s2734_s25 = sld [smem:[#allocation14_spill]] }
 0xca0   : > { %s2735_s3 = sld [smem:[#allocation16_spill]] }
 0xca1   : > { %s2737_s22 = smov %s2730_s27 }
 0xca3   :  { %1634 = vsyncpa [#allocation5], 1 }
 0xca4   :  { %1636 = vsyncpa [#allocation5 + $0x1], 1 }

</bundles_post_ra>
